<compile_context>
chip_gen: v7x
topology: tpu7x:2x2x1
jax: 0.10.0
libtpu: 0.0.40
codegen_flags: <defaults>
</compile_context>

<pallas_src>
import jax
import jax.numpy as jnp
from jax import lax
from jax.experimental import pallas as pl
from jax.experimental.pallas import tpu as pltpu


LANE = 128
NEG_BIG = -1e30  # padded-class bias: exp() underflows to 0, stays finite in f32


def _round_up(x, m):
    return (x + m - 1) // m * m


def dan_kernel(idx_ref, emb_ref, w1_ref, b1_ref, w2_ref, b2_ref, out_ref, acc_ref):
    """One (batch-tile, vocab-tile) grid step of the DAN forward pass."""
    v = pl.program_id(1)

    # ---- init the (TB, D) embedding-sum accumulator at the first vocab tile ----
    @pl.when(v == 0)
    def _():
        acc_ref[...] = jnp.zeros_like(acc_ref)

    TB, L = idx_ref.shape          # batch tile, (static) sequence length
    TV = emb_ref.shape[0]          # vocab tile

    # ---- bag-of-words counts for this vocab tile, built on the VPU ----
    # counts[b, t] = #{ l : ids[b, l] == v*TV + t }   (exact small integers)
    # Shift the (TB, L) ids once instead of adding v*TV into the (TB, TV) iota.
    ids_local = idx_ref[...] - v * TV                                 # (TB, L) int32
    iota_v = lax.broadcasted_iota(jnp.int32, (TB, TV), 1)             # (TB, TV)
    counts = jnp.zeros((TB, TV), jnp.float32)
    for l in range(L):             # L is static -> unrolled, keeps all ops 2-D
        counts = counts + (ids_local[:, l:l + 1] == iota_v).astype(jnp.float32)

    # ---- embedding contraction on the MXU: (TB,TV) @ (TV,D) -> f32 accumulate ----
    # counts <= L are exact in bf16 (for L <= 256), so this matmul is exact.
    acc_ref[...] += jnp.dot(counts.astype(jnp.bfloat16), emb_ref[...],
                            preferred_element_type=jnp.float32)

    # ---- finalize after the last vocab tile: mean -> fc1 -> relu -> fc2 -> logsoftmax ----
    @pl.when(v == pl.num_programs(1) - 1)
    def _():
        averaged = acc_ref[...] * (1.0 / L)                           # (TB, D) f32

        w1 = w1_ref[...].astype(jnp.float32)                          # (D, H)
        h = jnp.dot(averaged, w1, preferred_element_type=jnp.float32) + b1_ref[...]
        h = jnp.maximum(h, 0.0)                                       # (TB, H)

        w2 = w2_ref[...].astype(jnp.float32)                          # (H, 128)
        logits = jnp.dot(h, w2, preferred_element_type=jnp.float32) + b2_ref[...]

        # LogSoftmax over the lane axis; padded columns carry -1e30 bias so they
        # contribute exp(.) == 0 and never affect the max / logsumexp.
        m = jnp.max(logits, axis=-1, keepdims=True)
        shifted = logits - m
        lse = jnp.log(jnp.sum(jnp.exp(shifted), axis=-1, keepdims=True))
        out_ref[...] = shifted - lse                                   # (TB, 128)


def nn2dan_forward(x, emb, w1, b1, w2, b2):
    """x: (B, L) int token ids; emb: (V, D); w1: (D, H); w2: (H, 2) (pre-transposed).

    Returns (B, 2) log-probabilities, float32.
    """
    B, L = x.shape
    V, D = emb.shape
    H = w1.shape[1]
    n_cls = w2.shape[1]

    # ---- TPU-friendly padded shapes / tile sizes ----
    B_pad = _round_up(max(B, 8), 8)
    TB = min(256, B_pad)                       # big M tiles feed the MXU better
    B_pad = _round_up(B_pad, TB)

    D_pad = _round_up(D, LANE)
    H_pad = _round_up(H, LANE)
    NPAD = LANE                                # lane-dense output slab width

    # Vocab tile: as big as a ~2 MiB bf16 embedding tile allows (double-buffered
    # by the pipeline), capped at 2048; fewer grid steps + bigger DMAs.
    tv_budget = max(LANE, ((2 * 1024 * 1024) // (D_pad * 2)) // LANE * LANE)
    TV = min(_round_up(V, LANE), 2048, tv_budget)
    V_pad = _round_up(V, TV)

    # ---- pad & (bf16-)quantize parameters; in production these would be stored pre-padded ----
    idx_p = jnp.zeros((B_pad, L), jnp.int32).at[:B].set(x.astype(jnp.int32))
    emb_p = jnp.zeros((V_pad, D_pad), jnp.bfloat16).at[:V, :D].set(emb.astype(jnp.bfloat16))
    w1_p = jnp.zeros((D_pad, H_pad), jnp.bfloat16).at[:D, :H].set(w1.astype(jnp.bfloat16))
    b1_p = jnp.zeros((1, H_pad), jnp.float32).at[0, :H].set(b1.astype(jnp.float32))
    w2_p = jnp.zeros((H_pad, NPAD), jnp.bfloat16).at[:H, :n_cls].set(w2.astype(jnp.bfloat16))
    b2_p = jnp.full((1, NPAD), NEG_BIG, jnp.float32).at[0, :n_cls].set(b2.astype(jnp.float32))

    grid = (B_pad // TB, V_pad // TV)

    out_padded = pl.pallas_call(
        dan_kernel,
        out_shape=jax.ShapeDtypeStruct((B_pad, NPAD), jnp.float32),
        grid_spec=pltpu.PrefetchScalarGridSpec(
            num_scalar_prefetch=0,
            grid=grid,
            in_specs=[
                pl.BlockSpec((TB, L), lambda b, v: (b, 0)),         # token ids
                pl.BlockSpec((TV, D_pad), lambda b, v: (v, 0)),     # embedding tile (bf16)
                pl.BlockSpec((D_pad, H_pad), lambda b, v: (0, 0)),  # W1 (bf16)
                pl.BlockSpec((1, H_pad), lambda b, v: (0, 0)),      # b1
                pl.BlockSpec((H_pad, NPAD), lambda b, v: (0, 0)),   # W2 padded (bf16)
                pl.BlockSpec((1, NPAD), lambda b, v: (0, 0)),       # b2 padded
            ],
            out_specs=pl.BlockSpec((TB, NPAD), lambda b, v: (b, 0)),
            scratch_shapes=[pltpu.VMEM((TB, D_pad), jnp.float32)],  # embedding-sum accumulator
        ),
        compiler_params=pltpu.CompilerParams(
            dimension_semantics=("parallel", "arbitrary"),
            vmem_limit_bytes=32 * 1024 * 1024,
        ),
    )(idx_p, emb_p, w1_p, b1_p, w2_p, b2_p)

    return out_padded[:B, :n_cls]


def nn2dan_reference(x, emb, w1, b1, w2, b2):
    """Pure-JAX reference mirroring the PyTorch forward."""
    embedded = emb[x.astype(jnp.int32)]                       # (B, L, D)
    averaged = jnp.mean(embedded, axis=1)                     # (B, D)
    h = jax.nn.relu(averaged @ w1 + b1)                       # (B, H)
    logits = h @ w2 + b2                                      # (B, 2)
    return jax.nn.log_softmax(logits, axis=1)


if __name__ == "__main__":
    # Small shapes consistent with the module:
    B, L = 2, 8          # batch, sequence length (token ids)
    V, D = 64, 32        # vocab size, embedding dim == input_size
    H = 32               # hidden_size

    key = jax.random.PRNGKey(0)
    k_x, k_e, k_w1, k_b1, k_w2, k_b2 = jax.random.split(key, 6)

    x = jax.random.randint(k_x, (B, L), 0, V, dtype=jnp.int32)

    emb = jax.random.normal(k_e, (V, D), dtype=jnp.float32) * 0.1
    bound1 = 1.0 / jnp.sqrt(D)
    w1 = jax.random.uniform(k_w1, (D, H), jnp.float32, -bound1, bound1)   # fc1 weight^T
    b1 = jax.random.uniform(k_b1, (H,), jnp.float32, -bound1, bound1)
    bound2 = 1.0 / jnp.sqrt(H)
    w2 = jax.random.uniform(k_w2, (H, 2), jnp.float32, -bound2, bound2)   # fc2 weight^T
    b2 = jax.random.uniform(k_b2, (2,), jnp.float32, -bound2, bound2)

    out = nn2dan_forward(x, emb, w1, b1, w2, b2)
    out = jax.block_until_ready(out)

    # Reference uses the same bf16-stored weights (upcast to f32) so the check
    # compares identical math; the kernel accumulates in f32 throughout.
    emb_q = emb.astype(jnp.bfloat16).astype(jnp.float32)
    w1_q = w1.astype(jnp.bfloat16).astype(jnp.float32)
    w2_q = w2.astype(jnp.bfloat16).astype(jnp.float32)
    ref = nn2dan_reference(x, emb_q, w1, b1, w2_q, b2) if False else nn2dan_reference(x, emb_q, w1_q, b1, w2_q, b2)

    assert out.shape == (B, 2) and out.dtype == jnp.float32
    assert jnp.allclose(out, ref, atol=5e-3, rtol=1e-3), (out, ref)

    print("KERNEL_OK")
</pallas_src>

<mosaic_0001>
module attributes {stable_mosaic.version = 11 : i64} {
  func.func @dan_kernel(%arg0: i32, %arg1: i32, %arg2: memref<8x8xi32, #tpu.memory_space<vmem>>, %arg3: memref<128x128xbf16, #tpu.memory_space<vmem>>, %arg4: memref<128x128xbf16, #tpu.memory_space<vmem>>, %arg5: memref<1x128xf32, #tpu.memory_space<vmem>>, %arg6: memref<128x128xbf16, #tpu.memory_space<vmem>>, %arg7: memref<1x128xf32, #tpu.memory_space<vmem>>, %arg8: memref<8x128xf32, #tpu.memory_space<vmem>>, %arg9: memref<8x128xf32, #tpu.memory_space<vmem>>) attributes {dimension_semantics = [#tpu.dimension_semantics<parallel>, #tpu.dimension_semantics<arbitrary>], iteration_bounds = array<i64: 1, 1>, scalar_prefetch = 0 : i64, scratch_operands = 1 : i64, tpu.core_type = #tpu.core_type<tc>, window_params = [{transform_indices = @transform_0, window_bounds = array<i64: 8, 8>}, {transform_indices = @transform_1, window_bounds = array<i64: 128, 128>}, {pipeline_mode = #tpu.pipeline_mode<synchronous>, transform_indices = @transform_2, window_bounds = array<i64: 128, 128>}, {pipeline_mode = #tpu.pipeline_mode<synchronous>, transform_indices = @transform_3, window_bounds = array<i64: 1, 128>}, {pipeline_mode = #tpu.pipeline_mode<synchronous>, transform_indices = @transform_4, window_bounds = array<i64: 128, 128>}, {pipeline_mode = #tpu.pipeline_mode<synchronous>, transform_indices = @transform_5, window_bounds = array<i64: 1, 128>}, {transform_indices = @transform_6, window_bounds = array<i64: 8, 128>}]} {
    %c0_i32 = arith.constant 0 : i32
    %0 = arith.cmpi eq, %arg1, %c0_i32 : i32
    %1 = arith.extui %0 : i1 to i32
    %c0_i32_0 = arith.constant 0 : i32
    %2 = arith.cmpi ne, %1, %c0_i32_0 : i32
    scf.if %2 {
      %cst_11 = arith.constant 0.000000e+00 : f32
      %66 = vector.broadcast %cst_11 : f32 to vector<8x128xf32>
      %c0_12 = arith.constant 0 : index
      %c0_13 = arith.constant 0 : index
      %67 = vector.load %arg9[%c0_12, %c0_13] : memref<8x128xf32, #tpu.memory_space<vmem>>, vector<8x128xf32>
      tpu.vector_store %arg9[%c0_12, %c0_13], %66 {strides = array<i32>} : memref<8x128xf32, #tpu.memory_space<vmem>>, vector<8x128xf32>,
    } else {
    }
    %c0 = arith.constant 0 : index
    %c0_1 = arith.constant 0 : index
    %3 = vector.load %arg2[%c0, %c0_1] : memref<8x8xi32, #tpu.memory_space<vmem>>, vector<8x8xi32>
    %c128_i32 = arith.constant 128 : i32
    %4 = arith.muli %arg1, %c128_i32 : i32
    %5 = vector.broadcast %4 : i32 to vector<8x8xi32>
    %6 = arith.subi %3, %5 : vector<8x8xi32>
    %7 = tpu.iota {dimensions = array<i32: 1>} : vector<8x128xi32>
    %cst = arith.constant 0.000000e+00 : f32
    %8 = vector.broadcast %cst : f32 to vector<8x128xf32>
    %9 = vector.extract_strided_slice %6 {offsets = [0, 0], sizes = [8, 1], strides = [1, 1]} : vector<8x8xi32> to vector<8x1xi32>
    %10 = vector.broadcast %9 : vector<8x1xi32> to vector<8x128xi32>
    %11 = arith.cmpi eq, %10, %7 : vector<8x128xi32>
    %12 = arith.extui %11 : vector<8x128xi1> to vector<8x128xi32>
    %13 = arith.sitofp %12 : vector<8x128xi32> to vector<8x128xf32>
    %14 = arith.addf %8, %13 : vector<8x128xf32>
    %15 = vector.extract_strided_slice %6 {offsets = [0, 1], sizes = [8, 1], strides = [1, 1]} : vector<8x8xi32> to vector<8x1xi32>
    %16 = vector.broadcast %15 : vector<8x1xi32> to vector<8x128xi32>
    %17 = arith.cmpi eq, %16, %7 : vector<8x128xi32>
    %18 = arith.extui %17 : vector<8x128xi1> to vector<8x128xi32>
    %19 = arith.sitofp %18 : vector<8x128xi32> to vector<8x128xf32>
    %20 = arith.addf %14, %19 : vector<8x128xf32>
    %21 = vector.extract_strided_slice %6 {offsets = [0, 2], sizes = [8, 1], strides = [1, 1]} : vector<8x8xi32> to vector<8x1xi32>
    %22 = vector.broadcast %21 : vector<8x1xi32> to vector<8x128xi32>
    %23 = arith.cmpi eq, %22, %7 : vector<8x128xi32>
    %24 = arith.extui %23 : vector<8x128xi1> to vector<8x128xi32>
    %25 = arith.sitofp %24 : vector<8x128xi32> to vector<8x128xf32>
    %26 = arith.addf %20, %25 : vector<8x128xf32>
    %27 = vector.extract_strided_slice %6 {offsets = [0, 3], sizes = [8, 1], strides = [1, 1]} : vector<8x8xi32> to vector<8x1xi32>
    %28 = vector.broadcast %27 : vector<8x1xi32> to vector<8x128xi32>
    %29 = arith.cmpi eq, %28, %7 : vector<8x128xi32>
    %30 = arith.extui %29 : vector<8x128xi1> to vector<8x128xi32>
    %31 = arith.sitofp %30 : vector<8x128xi32> to vector<8x128xf32>
    %32 = arith.addf %26, %31 : vector<8x128xf32>
    %33 = vector.extract_strided_slice %6 {offsets = [0, 4], sizes = [8, 1], strides = [1, 1]} : vector<8x8xi32> to vector<8x1xi32>
    %34 = vector.broadcast %33 : vector<8x1xi32> to vector<8x128xi32>
    %35 = arith.cmpi eq, %34, %7 : vector<8x128xi32>
    %36 = arith.extui %35 : vector<8x128xi1> to vector<8x128xi32>
    %37 = arith.sitofp %36 : vector<8x128xi32> to vector<8x128xf32>
    %38 = arith.addf %32, %37 : vector<8x128xf32>
    %39 = vector.extract_strided_slice %6 {offsets = [0, 5], sizes = [8, 1], strides = [1, 1]} : vector<8x8xi32> to vector<8x1xi32>
    %40 = vector.broadcast %39 : vector<8x1xi32> to vector<8x128xi32>
    %41 = arith.cmpi eq, %40, %7 : vector<8x128xi32>
    %42 = arith.extui %41 : vector<8x128xi1> to vector<8x128xi32>
    %43 = arith.sitofp %42 : vector<8x128xi32> to vector<8x128xf32>
    %44 = arith.addf %38, %43 : vector<8x128xf32>
    %45 = vector.extract_strided_slice %6 {offsets = [0, 6], sizes = [8, 1], strides = [1, 1]} : vector<8x8xi32> to vector<8x1xi32>
    %46 = vector.broadcast %45 : vector<8x1xi32> to vector<8x128xi32>
    %47 = arith.cmpi eq, %46, %7 : vector<8x128xi32>
    %48 = arith.extui %47 : vector<8x128xi1> to vector<8x128xi32>
    %49 = arith.sitofp %48 : vector<8x128xi32> to vector<8x128xf32>
    %50 = arith.addf %44, %49 : vector<8x128xf32>
    %51 = vector.extract_strided_slice %6 {offsets = [0, 7], sizes = [8, 1], strides = [1, 1]} : vector<8x8xi32> to vector<8x1xi32>
    %52 = vector.broadcast %51 : vector<8x1xi32> to vector<8x128xi32>
    %53 = arith.cmpi eq, %52, %7 : vector<8x128xi32>
    %54 = arith.extui %53 : vector<8x128xi1> to vector<8x128xi32>
    %55 = arith.sitofp %54 : vector<8x128xi32> to vector<8x128xf32>
    %56 = arith.addf %50, %55 : vector<8x128xf32>
    %c0_2 = arith.constant 0 : index
    %c0_3 = arith.constant 0 : index
    %57 = vector.load %arg9[%c0_2, %c0_3] : memref<8x128xf32, #tpu.memory_space<vmem>>, vector<8x128xf32>
    %58 = arith.truncf %56 : vector<8x128xf32> to vector<8x128xbf16>
    %c0_4 = arith.constant 0 : index
    %c0_5 = arith.constant 0 : index
    %59 = vector.load %arg3[%c0_4, %c0_5] : memref<128x128xbf16, #tpu.memory_space<vmem>>, vector<128x128xbf16>
    %cst_6 = arith.constant dense<0.000000e+00> : vector<8x128xf32>
    %60 = tpu.matmul %58, %59, %cst_6 {dimension_numbers = #tpu.dot_dimension_numbers<[1], [0], [0], [1], [0, 0, 1, 1], [], []>} : vector<8x128xbf16>, vector<128x128xbf16>, vector<8x128xf32> -> vector<8x128xf32>
    %61 = arith.addf %57, %60 : vector<8x128xf32>
    %c0_7 = arith.constant 0 : index
    %c0_8 = arith.constant 0 : index
    %62 = vector.load %arg9[%c0_7, %c0_8] : memref<8x128xf32, #tpu.memory_space<vmem>>, vector<8x128xf32>
    tpu.vector_store %arg9[%c0_7, %c0_8], %61 {strides = array<i32>} : memref<8x128xf32, #tpu.memory_space<vmem>>, vector<8x128xf32>,
    %c0_i32_9 = arith.constant 0 : i32
    %63 = arith.cmpi eq, %arg1, %c0_i32_9 : i32
    %64 = arith.extui %63 : i1 to i32
    %c0_i32_10 = arith.constant 0 : i32
    %65 = arith.cmpi ne, %64, %c0_i32_10 : i32
    scf.if %65 {
      %c0_11 = arith.constant 0 : index
      %c0_12 = arith.constant 0 : index
      %66 = vector.load %arg9[%c0_11, %c0_12] : memref<8x128xf32, #tpu.memory_space<vmem>>, vector<8x128xf32>
      %cst_13 = arith.constant 1.250000e-01 : f32
      %67 = vector.broadcast %cst_13 : f32 to vector<8x128xf32>
      %68 = arith.mulf %66, %67 : vector<8x128xf32>
      %c0_14 = arith.constant 0 : index
      %c0_15 = arith.constant 0 : index
      %69 = vector.load %arg4[%c0_14, %c0_15] : memref<128x128xbf16, #tpu.memory_space<vmem>>, vector<128x128xbf16>
      %70 = arith.extf %69 : vector<128x128xbf16> to vector<128x128xf32>
      %cst_16 = arith.constant dense<0.000000e+00> : vector<8x128xf32>
      %71 = tpu.matmul %68, %70, %cst_16 {dimension_numbers = #tpu.dot_dimension_numbers<[1], [0], [0], [1], [0, 0, 1, 1], [], []>} : vector<8x128xf32>, vector<128x128xf32>, vector<8x128xf32> -> vector<8x128xf32>
      %c0_17 = arith.constant 0 : index
      %c0_18 = arith.constant 0 : index
      %72 = vector.load %arg5[%c0_17, %c0_18] : memref<1x128xf32, #tpu.memory_space<vmem>>, vector<1x128xf32>
      %73 = vector.broadcast %72 : vector<1x128xf32> to vector<8x128xf32>
      %74 = arith.addf %71, %73 : vector<8x128xf32>
      %cst_19 = arith.constant 0.000000e+00 : f32
      %75 = vector.broadcast %cst_19 : f32 to vector<8x128xf32>
      %76 = arith.maximumf %74, %75 : vector<8x128xf32>
      %c0_20 = arith.constant 0 : index
      %c0_21 = arith.constant 0 : index
      %77 = vector.load %arg6[%c0_20, %c0_21] : memref<128x128xbf16, #tpu.memory_space<vmem>>, vector<128x128xbf16>
      %78 = arith.extf %77 : vector<128x128xbf16> to vector<128x128xf32>
      %cst_22 = arith.constant dense<0.000000e+00> : vector<8x128xf32>
      %79 = tpu.matmul %76, %78, %cst_22 {dimension_numbers = #tpu.dot_dimension_numbers<[1], [0], [0], [1], [0, 0, 1, 1], [], []>} : vector<8x128xf32>, vector<128x128xf32>, vector<8x128xf32> -> vector<8x128xf32>
      %c0_23 = arith.constant 0 : index
      %c0_24 = arith.constant 0 : index
      %80 = vector.load %arg7[%c0_23, %c0_24] : memref<1x128xf32, #tpu.memory_space<vmem>>, vector<1x128xf32>
      %81 = vector.broadcast %80 : vector<1x128xf32> to vector<8x128xf32>
      %82 = arith.addf %79, %81 : vector<8x128xf32>
      %cst_25 = arith.constant dense<0xFF800000> : vector<8xf32>
      %83 = vector.multi_reduction <maximumf>, %82, %cst_25 [1] : vector<8x128xf32> to vector<8xf32>
      %84 = vector.shape_cast %83 : vector<8xf32> to vector<8x1xf32>
      %85 = vector.broadcast %84 : vector<8x1xf32> to vector<8x128xf32>
      %86 = arith.subf %82, %85 : vector<8x128xf32>
      %87 = math.exp %86 : vector<8x128xf32>
      %cst_26 = arith.constant dense<0.000000e+00> : vector<8xf32>
      %88 = vector.multi_reduction <add>, %87, %cst_26 [1] : vector<8x128xf32> to vector<8xf32>
      %89 = vector.shape_cast %88 : vector<8xf32> to vector<8x1xf32>
      %90 = math.log %89 : vector<8x1xf32>
      %91 = vector.broadcast %90 : vector<8x1xf32> to vector<8x128xf32>
      %92 = arith.subf %86, %91 : vector<8x128xf32>
      %c0_27 = arith.constant 0 : index
      %c0_28 = arith.constant 0 : index
      %93 = vector.load %arg8[%c0_27, %c0_28] : memref<8x128xf32, #tpu.memory_space<vmem>>, vector<8x128xf32>
      tpu.vector_store %arg8[%c0_27, %c0_28], %92 {strides = array<i32>} : memref<8x128xf32, #tpu.memory_space<vmem>>, vector<8x128xf32>,
    } else {
    }
    return
  }
  func.func @transform_0(%arg0: i32, %arg1: i32) -> (i32, i32) {
    %c0_i32 = arith.constant 0 : i32
    %c0_i32_0 = arith.constant 0 : i32
    return %arg0, %c0_i32 : i32, i32
  }
  func.func @transform_1(%arg0: i32, %arg1: i32) -> (i32, i32) {
    %c0_i32 = arith.constant 0 : i32
    %c0_i32_0 = arith.constant 0 : i32
    return %arg1, %c0_i32 : i32, i32
  }
  func.func @transform_2(%arg0: i32, %arg1: i32) -> (i32, i32) {
    %c0_i32 = arith.constant 0 : i32
    %c0_i32_0 = arith.constant 0 : i32
    %c0_i32_1 = arith.constant 0 : i32
    return %c0_i32, %c0_i32_0 : i32, i32
  }
  func.func @transform_3(%arg0: i32, %arg1: i32) -> (i32, i32) {
    %c0_i32 = arith.constant 0 : i32
    %c0_i32_0 = arith.constant 0 : i32
    %c0_i32_1 = arith.constant 0 : i32
    return %c0_i32, %c0_i32_0 : i32, i32
  }
  func.func @transform_4(%arg0: i32, %arg1: i32) -> (i32, i32) {
    %c0_i32 = arith.constant 0 : i32
    %c0_i32_0 = arith.constant 0 : i32
    %c0_i32_1 = arith.constant 0 : i32
    return %c0_i32, %c0_i32_0 : i32, i32
  }
  func.func @transform_5(%arg0: i32, %arg1: i32) -> (i32, i32) {
    %c0_i32 = arith.constant 0 : i32
    %c0_i32_0 = arith.constant 0 : i32
    %c0_i32_1 = arith.constant 0 : i32
    return %c0_i32, %c0_i32_0 : i32, i32
  }
  func.func @transform_6(%arg0: i32, %arg1: i32) -> (i32, i32) {
    %c0_i32 = arith.constant 0 : i32
    %c0_i32_0 = arith.constant 0 : i32
    return %arg0, %c0_i32 : i32, i32
  }
}

</mosaic_0001>

<bundles_post_ra>
// kernel: tpu_custom_call.1
= control target key start
LH: loop header
LB: loop body
LE: loop exit
PB: predicated region body
PF: predicated region fallthrough
CT: control target
= control target key end

     0   :  { %11 = vsyncpa [#allocation4], 0  ;;  %s1105_s0 = inlined_call_operand.hbm [shape: s32[8,8], index: 0, kind: input, shape index: {}]   ;;  %s1106_s1 = inlined_call_operand.hbm [shape: bf16[128,128], index: 1, kind: input, shape index: {}]   ;;  %s1107_s2 = inlined_call_operand.hbm [shape: bf16[128,128], index: 2, kind: input, shape index: {}]   ;;  %s1108_s3 = inlined_call_operand.vmem [shape: f32[1,128], index: 3, kind: input, shape index: {}]   ;;  %s1109_s4 = inlined_call_operand.hbm [shape: bf16[128,128], index: 4, kind: input, shape index: {}]   ;;  %s1110_s5 = inlined_call_operand.vmem [shape: f32[1,128], index: 5, kind: input, shape index: {}]   ;;  %s1111_s6 = inlined_call_operand.hbm [shape: f32[8,128], index: 6, kind: output, shape index: {}]  }
   0x1   :  { %12 = vsyncpa [#allocation7], 0 }
   0x2   :  { %13 = vsyncpa [#allocation10], 0 }
   0x3   :  { %14 = vsyncpa [#allocation5], 0  ;;  %s939_s21 = smov [#allocation6]   ;;  %s821_s25 = scalar_lea.hbm %s1106_s1, 1024 }
   0x4   :  { %s30_s22 = sshll.u32 %s939_s21, 4  ;;  %p822_p0 = scmp.ne.s32.totalorder %s1106_s1, %s821_s25  ;;  %s31_s22 = int_to_ptr.vmem [resolvable:$true] %s30_s22 }
   0x5   :  { %p825_p1 = scmp.lt.u32.totalorder %s821_s25, %s1106_s1 }
   0x7   :  { %p827_p2 = pnand %p825_p1, %p822_p0 }
   0x9   :  { %830 = shalt.err (!%p827_p2)
}
   0xa   :  { %s831_s30 = scalar_lea.vmem %s31_s22, 1024  ;;  %p836_p4 = scmp.lt.s32.totalorder %s31_s22, %s31_s22 }
   0xb   :  { %p832_p3 = scmp.ne.s32.totalorder %s31_s22, %s831_s30  ;;  %p837_p5 = scmp.lt.s32.totalorder %s831_s30, %s831_s30 }
   0xd   :  { %p838_p6 = por %p837_p5, %p836_p4 }
   0xf   :  { %p839_p7 = pnand %p838_p6, %p832_p3 }
  0x11   :  { %842 = shalt.err (!%p839_p7)
}
  0x12   :  { %s940_s7 = smov 64   ;;  %s941_s8 = smov 4  }
  0x13   :  { %36 = dma.hbm_to_vmem [thread:$0]  %s1106_s1, 1024, %s31_s22, [#allocation7], %s940_s7, %s940_s7, %s941_s8  }
  0x14   :  { %s942_s11 = smov [#allocation3]   ;;  %s943_s13 = smov [#allocation8]  }
  0x15   :  { %s21_s12 = sshll.u32 %s942_s11, 4  ;;  %s42_s14 = sshll.u32 %s943_s13, 4  ;;  %s22_s12 = int_to_ptr.vmem [resolvable:$true] %s21_s12  ;;  %s43_s14 = int_to_ptr.vmem [resolvable:$true] %s42_s14 }
  0x16   :  { %s843_s17 = scalar_lea.hbm %s1105_s0, 128 }
  0x17   :  { %p844_p8 = scmp.ne.s32.totalorder %s1105_s0, %s843_s17  ;;  %p847_p9 = scmp.lt.u32.totalorder %s843_s17, %s1105_s0 }
  0x19   :  { %p849_p10 = pnand %p847_p9, %p844_p8 }
  0x1b   :  { %852 = shalt.err (!%p849_p10)
}
  0x1c   :  { %s853_s1 = scalar_lea.vmem %s22_s12, 128  ;;  %p858_p12 = scmp.lt.s32.totalorder %s22_s12, %s22_s12 }
  0x1d   :  { %p854_p11 = scmp.ne.s32.totalorder %s22_s12, %s853_s1  ;;  %p859_p13 = scmp.lt.s32.totalorder %s853_s1, %s853_s1 }
  0x1f   :  { %p860_p0 = por %p859_p13, %p858_p12 }
  0x21   :  { %p861_p1 = pnand %p860_p0, %p854_p11 }
  0x23   :  { %864 = shalt.err (!%p861_p1)
}
  0x24   :  { %24 = dma.hbm_to_vmem [thread:$0]  %s1105_s0, 128, %s22_s12, [#allocation4]  }
  0x25   :  { %s865_s26 = scalar_lea.hbm %s1107_s2, 1024 }
  0x26   :  { %p866_p2 = scmp.ne.s32.totalorder %s1107_s2, %s865_s26  ;;  %p869_p3 = scmp.lt.u32.totalorder %s865_s26, %s1107_s2 }
  0x28   :  { %p871_p4 = pnand %p869_p3, %p866_p2 }
  0x2a   :  { %874 = shalt.err (!%p871_p4)
}
  0x2b   :  { %s875_s9 = scalar_lea.vmem %s43_s14, 1024  ;;  %p880_p6 = scmp.lt.s32.totalorder %s43_s14, %s43_s14 }
  0x2c   :  { %p876_p5 = scmp.ne.s32.totalorder %s43_s14, %s875_s9  ;;  %p881_p7 = scmp.lt.s32.totalorder %s875_s9, %s875_s9 }
  0x2e   :  { %p882_p8 = por %p881_p7, %p880_p6 }
  0x30   :  { %p883_p9 = pnand %p882_p8, %p876_p5 }
  0x32   :  { %886 = shalt.err (!%p883_p9)
}
  0x33   :  { %48 = dma.hbm_to_vmem [thread:$0]  %s1107_s2, 1024, %s43_s14, [#allocation7], %s940_s7, %s940_s7, %s941_s8  }
  0x34   :  { %s944_s11 = smov [#allocation9]   ;;  %s887_s16 = scalar_lea.hbm %s1109_s4, 1024 }
  0x35   :  { %s56_s12 = sshll.u32 %s944_s11, 4  ;;  %p888_p10 = scmp.ne.s32.totalorder %s1109_s4, %s887_s16  ;;  %s57_s12 = int_to_ptr.vmem [resolvable:$true] %s56_s12 }
  0x36   :  { %p891_p11 = scmp.lt.u32.totalorder %s887_s16, %s1109_s4 }
  0x38   :  { %p893_p12 = pnand %p891_p11, %p888_p10 }
  0x3a   :  { %896 = shalt.err (!%p893_p12)
}
  0x3b   :  { %s897_s21 = scalar_lea.vmem %s57_s12, 1024  ;;  %p902_p0 = scmp.lt.s32.totalorder %s57_s12, %s57_s12 }
  0x3c   :  { %p898_p13 = scmp.ne.s32.totalorder %s57_s12, %s897_s21  ;;  %p903_p1 = scmp.lt.s32.totalorder %s897_s21, %s897_s21 }
  0x3e   :  { %p904_p2 = por %p903_p1, %p902_p0 }
  0x40   :  { %p905_p3 = pnand %p904_p2, %p898_p13 }
  0x42   :  { %908 = shalt.err (!%p905_p3)
}
  0x43   :  { %62 = dma.hbm_to_vmem [thread:$0]  %s1109_s4, 1024, %s57_s12, [#allocation10], %s940_s7, %s940_s7, %s941_s8  }
  0x44   :  { %931 = dma.done.wait [#allocation4], 128  }
  0x45   :  { %932 = vsyncadd [#allocation4], 4294967168 }
  0x46   :  { %933 = dma.done.wait [#allocation7], 2048  }
  0x47   :  { %934 = vsyncadd [#allocation7], 4294965248 }
  0x48   :  { %935 = dma.done.wait [#allocation10], 1024  }
  0x49   :  { %936 = vsyncadd [#allocation10], 4294966272  ;;  %v945_v0 = vmov 2   ;;  %v946_v1 = vmov 0   ;;  %v947_v2 = vmov 0.0   ;;  %v83_v3 = vld [vmem:[#allocation3] sm:$0xff]  ;;  %v87_v26 = vlaneseq }
  0x4a   :  { %802 = vset.pattern.permute.xlu1 %v945_v0  ;;  %800 = vset.pattern.permute.xlu0 %v946_v1  ;;  %v809_v4 = vld [vmem:[#allocation6] sm:$0xff]   ;;  %v810_v5 = vld [vmem:[#allocation6 + $0x8] sm:$0xff]   ;;  %v948_v6 = vmov 3   ;;  %v949_v7 = vmov 1   ;;  %v811_v8 = vld [vmem:[#allocation6 + $0x10] sm:$0xff]   ;;  %v950_v9 = vmov 4  }
  0x4b   :  { %644 = vmatprep.subr.bf16.mxu0 %v947_v2  ;;  %104 = vperm.xlu1 %802, %v83_v3   ;;  %v951_v10 = vmov 5   ;;  %v812_v11 = vld [vmem:[#allocation6 + $0x18] sm:$0xff]   ;;  %v952_v12 = vmov 6   ;;  %v953_v13 = vmov 7   ;;  %v813_v14 = vld [vmem:[#allocation6 + $0x20] sm:$0xff]   ;;  %v814_v15 = vld [vmem:[#allocation6 + $0x28] sm:$0xff]  }
  0x4c   :  { %90 = vperm.xlu0 %800, %v83_v3   ;;  %645 = vmatpush3.bf16.msra.mxu0 %v809_v4  ;;  %v815_v16 = vld [vmem:[#allocation6 + $0x30] sm:$0xff]   ;;  %vm954_vm0 = vmmov 0   ;;  %v524_v17 = vld [vmem:[#allocation8] sm:$0xff]   ;;  %v816_v18 = vld [vmem:[#allocation6 + $0x38] sm:$0xff]   ;;  %v955_v19 = vmov 0.0|0.0   ;;  %v88_v29 = vand.u32 127, %v87_v26 }
  0x4d   :  { %646 = vmatprep.subr.bf16.mxu0 %v947_v2  ;;  %660 = vmatprep.mubr.msk.bf16.mxu0 %vm954_vm0, %v947_v2  ;;  %v587_v20 = vld [vmem:[#allocation8 + $0x8] sm:$0xff]   ;;  %v588_v21 = vld [vmem:[#allocation8 + $0x10] sm:$0xff]   ;;  %v589_v22 = vld [vmem:[#allocation8 + $0x18] sm:$0xff]  }
  0x4e   :  { %696 = vmatprep.mubr.msk.f32.mxu1 %vm954_vm0, %v947_v2  ;;  %734 = vmatprep.subr.bf16.mxu1 %v955_v19  ;;  %v590_v23 = vld [vmem:[#allocation8 + $0x20] sm:$0xff]   ;;  %v591_v24 = vld [vmem:[#allocation8 + $0x28] sm:$0xff]   ;;  %v592_v25 = vld [vmem:[#allocation8 + $0x30] sm:$0xff]  }
  0x4f   :  { %803 = vset.pattern.permute.xlu1 %v948_v6  ;;  %736 = vmatpush3.bf16.msra.mxu1 %v524_v17  ;;  %v593_v52 = vld [vmem:[#allocation8 + $0x38] sm:$0xff]   ;;  %v556_v53 = vld [vmem:[#allocation9] sm:$0xff]   ;;  %v594_v54 = vld [vmem:[#allocation9 + $0x8] sm:$0xff]  }
  0x50   :  { %801 = vset.pattern.permute.xlu0 %v949_v7  ;;  %111 = vperm.xlu1 %803, %v83_v3   ;;  %v595_v55 = vld [vmem:[#allocation9 + $0x10] sm:$0xff]   ;;  %v596_v56 = vld [vmem:[#allocation9 + $0x18] sm:$0xff]   ;;  %v597_v57 = vld [vmem:[#allocation9 + $0x20] sm:$0xff]  }
  0x51   :  { %97 = vperm.xlu0 %801, %v83_v3   ;;  %647 = vmatpush3.bf16.msra.mxu0 %v810_v5  ;;  %v598_v58 = vld [vmem:[#allocation9 + $0x28] sm:$0xff]   ;;  %v599_v59 = vld [vmem:[#allocation9 + $0x30] sm:$0xff]   ;;  %v600_v1 = vld [vmem:[#allocation9 + $0x38] sm:$0xff]  }
  0x52   :  { %648 = vmatprep.subr.bf16.mxu0 %v947_v2  ;;  %737 = vmatprep.subr.bf16.mxu1 %v955_v19  ;;  %v522_v7 = vld [vmem:[%s1110_s5] ss:$0 sm:$0xff] }
  0x53   :  { %739 = vmatpush3.bf16.msra.mxu1 %v587_v20 }
  0x54   :  { %804 = vset.pattern.permute.xlu1 %v950_v9  ;;  %740 = vmatprep.subr.bf16.mxu1 %v955_v19 }
  0x55   :  { %805 = vset.pattern.permute.xlu0 %v951_v10  ;;  %118 = vperm.xlu1 %804, %v83_v3  }
  0x56   :  { %125 = vperm.xlu0 %805, %v83_v3   ;;  %649 = vmatpush3.bf16.msra.mxu0 %v811_v8 }
  0x57   :  { %650 = vmatprep.subr.bf16.mxu0 %v947_v2  ;;  %742 = vmatpush3.bf16.msra.mxu1 %v588_v21 }
  0x58   :  { %743 = vmatprep.subr.bf16.mxu1 %v955_v19 }
  0x59   :  { %806 = vset.pattern.permute.xlu1 %v952_v12 }
  0x5a   :  { %808 = vset.pattern.permute.xlu0 %v953_v13  ;;  %132 = vperm.xlu1 %806, %v83_v3  }
  0x5b   :  { %651 = vmatpush3.bf16.msra.mxu0 %v812_v11  ;;  %745 = vmatpush3.bf16.msra.mxu1 %v589_v22 }
  0x5c   :  { %652 = vmatprep.subr.bf16.mxu0 %v947_v2  ;;  %746 = vmatprep.subr.bf16.mxu1 %v955_v19 }
  0x5e   :  { %807 = vset.pattern.permute.xlu1 %v953_v13 }
  0x5f   :  { %653 = vmatpush3.bf16.msra.mxu0 %v813_v14  ;;  %139 = vperm.xlu1 %807, %v83_v3  }
  0x60   :  { %654 = vmatprep.subr.bf16.mxu0 %v947_v2  ;;  %748 = vmatpush3.bf16.msra.mxu1 %v590_v23 }
  0x61   :  { %749 = vmatprep.subr.bf16.mxu1 %v955_v19 }
  0x63   :  { %655 = vmatpush3.bf16.msra.mxu0 %v814_v15 }
  0x64   :  { %656 = vmatprep.subr.bf16.mxu0 %v947_v2  ;;  %751 = vmatpush3.bf16.msra.mxu1 %v591_v24 }
  0x65   :  { %752 = vmatprep.subr.bf16.mxu1 %v955_v19 }
  0x67   :  { %657 = vmatpush3.bf16.msra.mxu0 %v815_v16 }
  0x68   :  { %658 = vmatprep.subr.bf16.mxu0 %v947_v2  ;;  %754 = vmatpush3.bf16.msra.mxu1 %v592_v25 }
  0x69   :  { %755 = vmatprep.subr.bf16.mxu1 %v955_v19 }
  0x6b   :  { %659 = vmatpush3.bf16.msra.mxu0 %v816_v18 }
  0x6c   :  { %758 = vmatprep.subr.bf16.mxu0 %v955_v19  ;;  %757 = vmatpush3.bf16.msra.mxu1 %v593_v52 }
  0xca   :  { %v105_v27 = vpop.permute.xlu1 %104 }
  0xcb   :  { %v91_v28 = vpop.permute.xlu0 %90  ;;  %vm106_vm2 = vcmp.eq.s32.totalorder %v105_v27, %v88_v29 }
  0xcc   :  { %vm92_vm1 = vcmp.eq.s32.totalorder %v91_v28, %v88_v29  ;;  %v507_v35 = vsel %vm106_vm2, 1.0, %v947_v2 }
  0xcd   :  { %v505_v32 = vsel %vm92_vm1, 1.0, %v947_v2 }
  0xcf   :  { %v112_v30 = vpop.permute.xlu1 %111 }
  0xd0   :  { %v98_v31 = vpop.permute.xlu0 %97  ;;  %vm113_vm4 = vcmp.eq.s32.totalorder %v112_v30, %v88_v29 }
  0xd1   :  { %vm99_vm3 = vcmp.eq.s32.totalorder %v98_v31, %v88_v29  ;;  %v508_v39 = vsel %vm113_vm4, 1.0, %v947_v2 }
  0xd2   :  { %v506_v33 = vsel %vm99_vm3, 1.0, %v947_v2 }
  0xd3   :  { %v102_v34 = vadd.f32 %v506_v33, %v505_v32 }
  0xd4   :  { %v119_v37 = vpop.permute.xlu1 %118 }
  0xd5   :  { %v109_v36 = vadd.f32 %v507_v35, %v102_v34  ;;  %v126_v38 = vpop.permute.xlu0 %125  ;;  %vm120_vm5 = vcmp.eq.s32.totalorder %v119_v37, %v88_v29 }
  0xd6   :  { %vm127_vm6 = vcmp.eq.s32.totalorder %v126_v38, %v88_v29  ;;  %v509_v41 = vsel %vm120_vm5, 1.0, %v947_v2 }
  0xd7   :  { %v116_v40 = vadd.f32 %v508_v39, %v109_v36  ;;  %v510_v43 = vsel %vm127_vm6, 1.0, %v947_v2 }
  0xd9   :  { %v123_v42 = vadd.f32 %v509_v41, %v116_v40  ;;  %v133_v44 = vpop.permute.xlu1 %132 }
  0xda   :  { %vm134_vm7 = vcmp.eq.s32.totalorder %v133_v44, %v88_v29 }
  0xdb   :  { %v130_v45 = vadd.f32 %v510_v43, %v123_v42  ;;  %v511_v46 = vsel %vm134_vm7, 1.0, %v947_v2 }
  0xdd   :  { %v137_v48 = vadd.f32 %v511_v46, %v130_v45 }
  0xde   :  { %v140_v47 = vpop.permute.xlu1 %139 }
  0xdf   :  { %vm141_vm8 = vcmp.eq.s32.totalorder %v140_v47, %v88_v29 }
  0xe0   :  { %v512_v49 = vsel %vm141_vm8, 1.0, %v947_v2 }
  0xe1   :  { %v144_v50 = vadd.f32 %v512_v49, %v137_v48 }
  0xe3   :  { %v146_v51 = vpack.c.bf16 %v144_v50, %v144_v50 }
  0xe5   :  { %661 = vmatmul.mubr.bf16.vlgmr.msra.gmra.mrb[0].mxu0 %v146_v51 }
  0xe6   :  { %731 = vmatprep.mubr.msk.f32.mxu0 %vm954_vm0, %v947_v2  ;;  %760 = vmatpush3.bf16.msra.mxu0 %v556_v53  ;;  %v521_v2 = vld [vmem:[%s1108_s3] ss:$0 sm:$0xff]  ;;  %s956_s3 = smov [#allocation11]  }
  0xe7   :  { %761 = vmatprep.subr.bf16.mxu0 %v955_v19  ;;  %s494_s22 = sshll.u32 %s956_s3, 4  ;;  %s495_s22 = int_to_ptr.vmem [resolvable:$true] %s494_s22 }
  0xe8   :  { %s909_s5 = scalar_lea.vmem %s495_s22, 128  ;;  %p914_p5 = scmp.lt.s32.totalorder %s495_s22, %s495_s22 }
  0xe9   :  { %p910_p4 = scmp.ne.s32.totalorder %s495_s22, %s909_s5  ;;  %p915_p6 = scmp.lt.s32.totalorder %s909_s5, %s909_s5 }
  0xea   :  { %763 = vmatpush3.bf16.msra.mxu0 %v594_v54 }
  0xeb   :  { %764 = vmatprep.subr.bf16.mxu0 %v955_v19  ;;  %p916_p7 = por %p915_p6, %p914_p5 }
  0xed   :  { %p917_p8 = pnand %p916_p7, %p910_p4 }
  0xee   :  { %766 = vmatpush3.bf16.msra.mxu0 %v595_v55 }
  0xef   :  { %767 = vmatprep.subr.bf16.mxu0 %v955_v19 }
  0xf2   :  { %769 = vmatpush3.bf16.msra.mxu0 %v596_v56 }
  0xf3   :  { %770 = vmatprep.subr.bf16.mxu0 %v955_v19 }
  0xf6   :  { %772 = vmatpush3.bf16.msra.mxu0 %v597_v57 }
  0xf7   :  { %773 = vmatprep.subr.bf16.mxu0 %v955_v19 }
  0xfa   :  { %775 = vmatpush3.bf16.msra.mxu0 %v598_v58 }
  0xfb   :  { %776 = vmatprep.subr.bf16.mxu0 %v955_v19 }
  0xfe   :  { %778 = vmatpush3.bf16.msra.mxu0 %v599_v59 }
  0xff   :  { %779 = vmatprep.subr.bf16.mxu0 %v955_v19 }
 0x102   :  { %781 = vmatpush3.bf16.msra.mxu0 %v600_v1 }
 0x1b8   :  { %v245_v60 = vpop.f32.mrb[0].mxu0 }
 0x1b9   :  { %v257_v61 = vmul.f32 0.125, %v245_v60  ;;  %v662_v62 = vpop.f32.mrb[1].mxu0 }
 0x1ba   :  { %v248_v63 = vpop.f32.mrb[2].mxu0 }
 0x1bb   :  { %v663_v0 = vpop.f32.mrb[3].mxu0  ;;  %697 = vmatmul.mubr.f32.vlgmr.msra.gmra.mrb[0].mxu1 %v257_v61 }
 0x28e   :  { %v363_v3 = vpop.f32.mrb[0].mxu1 }
 0x28f   :  { %v364_v4 = vadd.f32 %v521_v2, %v363_v3  ;;  %v698_v5 = vpop.f32.mrb[1].mxu1 }
 0x291   :  { %v367_v6 = vmax.f32 %v364_v4, 0.0 }
 0x293   :  { %732 = vmatmul.mubr.f32.vlgmr.msra.gmra.mrb[4].mxu0 %v367_v6 }
 0x366   :  { %v473_v8 = vpop.f32.mrb[4].mxu0 }
 0x367   :  { %v474_v9 = vadd.f32 %v522_v7, %v473_v8  ;;  %v733_v10 = vpop.f32.mrb[5].mxu0 }
 0x369   :  { %477 = vmax.xlane.f32.xlu0 %v474_v9 }
 0x3f6   :  { %v478_v11 = vpop.xlane.xlu0 %477 }
 0x3f7   :  { %v479_v12 = vsub.f32 %v474_v9, %v478_v11 }
 0x3f9   :  { %v480_v13 = vmul.f32 1.442695, %v479_v12 }
 0x3fb   :  { %817 = vpow2.f32 %v480_v13 }
 0x405   :  { %v818_v14 = vpop.eup %817 }
 0x406   :  { %482 = vadd.xlane.f32.xlu1 %v818_v14 }
 0x493   :  { %v483_v15 = vpop.xlane.xlu1 %482 }
 0x494   :  { %819 = vlog2.f32 %v483_v15 }
 0x49e   :  { %v820_v16 = vpop.eup %819 }
 0x49f   :  { %v485_v17 = vmul.f32 0.6931472, %v820_v16 }
 0x4a1   :  { %v486_v18 = vsub.f32 %v479_v12, %v485_v17 }
 0x4a3   :  { %487 = vst [vmem:[#allocation11] sm:$0xff] %v486_v18 }
 0x4a4   :  { %920 = shalt.err (!%p917_p8)
}
 0x4a5   :  { %s921_s25 = scalar_lea.hbm %s1111_s6, 128 }
 0x4a6   :  { %p922_p9 = scmp.ne.s32.totalorder %s1111_s6, %s921_s25  ;;  %p925_p10 = scmp.lt.u32.totalorder %s921_s25, %s1111_s6 }
 0x4a8   :  { %p927_p11 = pnand %p925_p10, %p922_p9 }
 0x4aa   :  { %930 = shalt.err (!%p927_p11)
}
 0x4ab   :  { %497 = dma.vmem_to_hbm [thread:$0]  %s495_s22, 128, %s1111_s6, [#allocation5]  }
 0x4ac   :  { %937 = dma.done.wait [#allocation5], 128  }
 0x4ad   :  { %938 = vsyncadd [#allocation5], 4294967168 }
 0x4ae   :  { %501 = vsyncpa [#allocation4], 1 }
 0x4af   :  { %502 = vsyncpa [#allocation7], 1 }
 0x4b0   :  { %503 = vsyncpa [#allocation10], 1 }
 0x4b1   :  { %504 = vsyncpa [#allocation5], 1 }

</bundles_post_ra>
